<compile_context>
chip_gen: v7x
topology: tpu7x:2x2x1
jax: 0.10.0
libtpu: 0.0.40
codegen_flags: <defaults>
</compile_context>

<pallas_src>
import functools

import jax
import jax.numpy as jnp
from jax.experimental import pallas as pl
from jax.experimental.pallas import tpu as pltpu


def _word_embedding_kernel(ids_ref, table_ref, out_ref, *, pack):
    # ids_ref:   (R, pack)         int32 -- `pack` consecutive tokens per packed row
    # table_ref: (pack*Vp, pack*D) f32   -- block-diagonal replicated embedding table
    # out_ref:   (R, pack*D)       f32   -- `pack` embeddings packed lane-dense per row
    R = ids_ref.shape[0]
    KV = table_ref.shape[0]
    Vp = KV // pack

    ids = ids_ref[...]                                            # (R, pack)
    lane_iota = jax.lax.broadcasted_iota(jnp.int32, (R, KV), 1)   # 0 .. pack*Vp-1

    # Boolean hit mask: row r has a hit at lane j*Vp + ids[r, j] for each j.
    # Single bool->f32 convert at the end; 0/1 in f32 is exact, so the f32 x f32 MXU
    # matmul below reproduces table rows bit-exactly.
    hit = lane_iota == ids[:, 0:1]                                # j = 0 (offset 0)
    for j in range(1, pack):                                      # tiny unrolled loop
        hit = jnp.logical_or(hit, lane_iota == (ids[:, j:j + 1] + j * Vp))
    onehot = hit.astype(jnp.float32)                              # (R, KV) f32

    emb = jnp.dot(onehot, table_ref[...],
                  preferred_element_type=jnp.float32)             # (R, pack*D) on MXU
    # Dropout (eval / inference) is identity; tanh runs on the EUP slot (free here).
    out_ref[...] = jnp.tanh(emb)


def _packing_factor(emb_dim):
    """How many D-wide embeddings fit in one 128-lane output row."""
    if emb_dim % 128 == 0:
        return 1
    assert 128 % emb_dim == 0, "emb_dim must divide 128 (or be a multiple of 128)"
    return 128 // emb_dim


def prepare_word_embedding_table(emb_table):
    """One-time (init) packing of the (V, D) table into the kernel layout.

    Hoisted out of the forward path per perf review: pads the vocab to a multiple of
    128 and replicates the table block-diagonally to (pack*Vp, pack*D).  Call once and
    pass the result to word_embedding_forward.
    """
    V, D = emb_table.shape
    pack = _packing_factor(D)
    Vp = ((V + 127) // 128) * 128
    table_p = jnp.zeros((Vp, D), emb_table.dtype).at[:V, :].set(emb_table)
    # Block-diagonal replication so `pack` token embeddings land side by side in one
    # lane-dense 128-wide output row.
    return jax.scipy.linalg.block_diag(*([table_p] * pack))


def _choose_token_block(n_tokens, pack, target_tokens):
    """Largest divisor of n_tokens that is a multiple of 8*pack and <= target_tokens,
    preferring >= 2 grid steps so both v7x TensorCores get work."""
    quantum = 8 * pack
    if n_tokens % quantum != 0:
        # TODO(synk): ragged N needs padding or a masked tail block.
        raise ValueError(f"B*S = {n_tokens} must be a multiple of 8*pack = {quantum}")
    cap = max(min(target_tokens, n_tokens) // quantum * quantum, quantum)
    candidates = [tb for tb in range(quantum, cap + 1, quantum) if n_tokens % tb == 0]
    multi_step = [tb for tb in candidates if n_tokens // tb >= 2]
    pool = multi_step if multi_step else candidates
    return max(pool)


@functools.partial(jax.jit, static_argnames=("emb_dim", "target_tokens_per_step"))
def word_embedding_forward(x_ids, table_tiled, *, emb_dim, target_tokens_per_step=4096):
    """x_ids: (B, S) int token ids; table_tiled: prepare_word_embedding_table output.

    Returns tanh(dropout_eval(embedding(x_ids))) of shape (B, S, emb_dim), f32.
    target_tokens_per_step: ~4096 is a good default (v5e can use 2048, v7x prefers
    8192); it is auto-capped so the grid has >= 2 "parallel" steps when N allows.
    """
    B, S = x_ids.shape
    N = B * S
    pack = _packing_factor(emb_dim)
    lane_w = pack * emb_dim
    KV, lw = table_tiled.shape
    assert lw == lane_w and KV % pack == 0 and (KV // pack) % 128 == 0, \
        "table_tiled must come from prepare_word_embedding_table"

    token_block = _choose_token_block(N, pack, target_tokens_per_step)
    R = token_block // pack                      # packed rows per grid step
    grid = (N // token_block,)

    ids2 = x_ids.reshape(N // pack, pack).astype(jnp.int32)

    out_packed = pl.pallas_call(
        functools.partial(_word_embedding_kernel, pack=pack),
        out_shape=jax.ShapeDtypeStruct((N // pack, lane_w), jnp.float32),
        grid_spec=pltpu.PrefetchScalarGridSpec(
            num_scalar_prefetch=0,
            grid=grid,
            in_specs=[
                pl.BlockSpec((R, pack), lambda i: (i, 0)),      # token ids (see TODO)
                pl.BlockSpec((KV, lane_w), lambda i: (0, 0)),   # full table, constant
            ],
            out_specs=pl.BlockSpec((R, lane_w), lambda i: (i, 0)),
        ),
        # "parallel" shards token blocks across TensorCores on v7x; grid always has
        # >= 2 steps when N allows so both cores get work.  Default scoped VMEM is
        # plenty for the ~6 MiB footprint at R=1024; set vmem_limit_bytes here if R or
        # the vocab is grown (v7x budget: 64 MiB physical / 32 MiB default scoped).
        compiler_params=pltpu.CompilerParams(dimension_semantics=("parallel",)),
    )(ids2, table_tiled)

    # (N//pack, pack*D) f32 row-major is bit-identical to (N, D): free reshape.
    return out_packed.reshape(B, S, emb_dim)


if __name__ == "__main__":
    # wordembedding_config: padding_idx=99 -> vocab = padding_idx + 1 = 100, emb_dim=32
    padding_idx = 99
    vocab = padding_idx + 1
    emb_dim = 32
    batch, seq = 2, 64

    key = jax.random.PRNGKey(0)
    k_w, k_x = jax.random.split(key)

    # Deterministic embedding weights; padding_idx row zeroed (nn.Embedding semantics).
    emb_table = jax.random.normal(k_w, (vocab, emb_dim), dtype=jnp.float32)
    emb_table = emb_table.at[padding_idx].set(0.0)

    # Token ids in [0, vocab), include some padding tokens.
    # NOTE: out-of-range ids (>= vocab) would produce a zero row (tanh(0)=0) instead of
    # the index error nn.Embedding would raise — documented semantic difference.
    x = jax.random.randint(k_x, (batch, seq), 0, vocab, dtype=jnp.int32)
    x = x.at[0, :4].set(padding_idx)

    # One-time init-side packing (hoisted out of the per-call forward path).
    table_tiled = jax.block_until_ready(prepare_word_embedding_table(emb_table))

    out = word_embedding_forward(x, table_tiled, emb_dim=emb_dim)
    out = jax.block_until_ready(out)

    # Reference: tanh(dropout_eval(embedding(x))) == tanh(table[x])
    ref = jnp.tanh(emb_table[x])
    assert out.shape == (batch, seq, emb_dim)
    assert jnp.allclose(out, ref, atol=1e-5, rtol=1e-5)
    print("KERNEL_OK")
</pallas_src>

<mosaic_0001>
module attributes {stable_mosaic.version = 11 : i64} {
  func.func @_word_embedding_kernel(%arg0: i32, %arg1: memref<16x4xi32, #tpu.memory_space<vmem>>, %arg2: memref<512x128xf32, #tpu.memory_space<vmem>>, %arg3: memref<16x128xf32, #tpu.memory_space<vmem>>) attributes {dimension_semantics = [#tpu.dimension_semantics<parallel>], iteration_bounds = array<i64: 2>, scalar_prefetch = 0 : i64, scratch_operands = 0 : i64, tpu.core_type = #tpu.core_type<tc>, window_params = [{transform_indices = @transform_0, window_bounds = array<i64: 16, 4>}, {pipeline_mode = #tpu.pipeline_mode<synchronous>, transform_indices = @transform_1, window_bounds = array<i64: 512, 128>}, {transform_indices = @transform_2, window_bounds = array<i64: 16, 128>}]} {
    %c0 = arith.constant 0 : index
    %c0_0 = arith.constant 0 : index
    %0 = vector.load %arg1[%c0, %c0_0] : memref<16x4xi32, #tpu.memory_space<vmem>>, vector<16x4xi32>
    %1 = tpu.iota {dimensions = array<i32: 1>} : vector<16x512xi32>
    %2 = vector.extract_strided_slice %0 {offsets = [0, 0], sizes = [16, 1], strides = [1, 1]} : vector<16x4xi32> to vector<16x1xi32>
    %3 = vector.broadcast %2 : vector<16x1xi32> to vector<16x512xi32>
    %4 = arith.cmpi eq, %1, %3 : vector<16x512xi32>
    %5 = vector.extract_strided_slice %0 {offsets = [0, 1], sizes = [16, 1], strides = [1, 1]} : vector<16x4xi32> to vector<16x1xi32>
    %c128_i32 = arith.constant 128 : i32
    %6 = vector.broadcast %c128_i32 : i32 to vector<16x1xi32>
    %7 = arith.addi %5, %6 : vector<16x1xi32>
    %8 = vector.broadcast %7 : vector<16x1xi32> to vector<16x512xi32>
    %9 = arith.cmpi eq, %1, %8 : vector<16x512xi32>
    %10 = arith.ori %4, %9 : vector<16x512xi1>
    %11 = vector.extract_strided_slice %0 {offsets = [0, 2], sizes = [16, 1], strides = [1, 1]} : vector<16x4xi32> to vector<16x1xi32>
    %c256_i32 = arith.constant 256 : i32
    %12 = vector.broadcast %c256_i32 : i32 to vector<16x1xi32>
    %13 = arith.addi %11, %12 : vector<16x1xi32>
    %14 = vector.broadcast %13 : vector<16x1xi32> to vector<16x512xi32>
    %15 = arith.cmpi eq, %1, %14 : vector<16x512xi32>
    %16 = arith.ori %10, %15 : vector<16x512xi1>
    %17 = vector.extract_strided_slice %0 {offsets = [0, 3], sizes = [16, 1], strides = [1, 1]} : vector<16x4xi32> to vector<16x1xi32>
    %c384_i32 = arith.constant 384 : i32
    %18 = vector.broadcast %c384_i32 : i32 to vector<16x1xi32>
    %19 = arith.addi %17, %18 : vector<16x1xi32>
    %20 = vector.broadcast %19 : vector<16x1xi32> to vector<16x512xi32>
    %21 = arith.cmpi eq, %1, %20 : vector<16x512xi32>
    %22 = arith.ori %16, %21 : vector<16x512xi1>
    %23 = arith.extui %22 : vector<16x512xi1> to vector<16x512xi32>
    %24 = arith.sitofp %23 : vector<16x512xi32> to vector<16x512xf32>
    %c0_1 = arith.constant 0 : index
    %c0_2 = arith.constant 0 : index
    %25 = vector.load %arg2[%c0_1, %c0_2] : memref<512x128xf32, #tpu.memory_space<vmem>>, vector<512x128xf32>
    %cst = arith.constant dense<0.000000e+00> : vector<16x128xf32>
    %26 = tpu.matmul %24, %25, %cst {dimension_numbers = #tpu.dot_dimension_numbers<[1], [0], [0], [1], [0, 0, 1, 1], [], []>} : vector<16x512xf32>, vector<512x128xf32>, vector<16x128xf32> -> vector<16x128xf32>
    %27 = math.tanh %26 : vector<16x128xf32>
    %c0_3 = arith.constant 0 : index
    %c0_4 = arith.constant 0 : index
    %28 = vector.load %arg3[%c0_3, %c0_4] : memref<16x128xf32, #tpu.memory_space<vmem>>, vector<16x128xf32>
    tpu.vector_store %arg3[%c0_3, %c0_4], %27 {strides = array<i32>} : memref<16x128xf32, #tpu.memory_space<vmem>>, vector<16x128xf32>,
    return
  }
  func.func @transform_0(%arg0: i32) -> (i32, i32) {
    %c0_i32 = arith.constant 0 : i32
    %c0_i32_0 = arith.constant 0 : i32
    return %arg0, %c0_i32 : i32, i32
  }
  func.func @transform_1(%arg0: i32) -> (i32, i32) {
    %c0_i32 = arith.constant 0 : i32
    %c0_i32_0 = arith.constant 0 : i32
    %c0_i32_1 = arith.constant 0 : i32
    return %c0_i32, %c0_i32_0 : i32, i32
  }
  func.func @transform_2(%arg0: i32) -> (i32, i32) {
    %c0_i32 = arith.constant 0 : i32
    %c0_i32_0 = arith.constant 0 : i32
    return %arg0, %c0_i32 : i32, i32
  }
}

</mosaic_0001>

<bundles_post_ra>
// kernel: word_embedding_forward.1
= control target key start
LH: loop header
LB: loop body
LE: loop exit
PB: predicated region body
PF: predicated region fallthrough
CT: control target
= control target key end

     0   :  { %7 = vsyncpa [#allocation3], 0  ;;  %s826_s9 = smov 0   ;;  %s917_s0 = inlined_call_operand.vmem [shape: s32[32,4], index: 0, kind: input, shape index: {}]   ;;  %s918_s1 = inlined_call_operand.hbm [shape: f32[512,128], index: 1, kind: input, shape index: {}]   ;;  %s919_s2 = inlined_call_operand.vmem [shape: f32[32,128], index: 2, kind: output, shape index: {}]  }
   0x1 LB: > { %s557_s10 = sadd.s32 4294967295, %s801_s9   ;;  %p559_p0 = scmp.ge.s32.totalorder %s801_s9, 1  ;;  %s801_s9 = sphi %s826_s9, %s13_s9  }
   0x2   : > { %p91_p1 = scmp.lt.s32.totalorder %s801_s9, 3  ;;  %s803_s11 = smov [#allocation2]  }
   0x3   : > { %s103_s12 = sshll.u32 %s803_s11, 4  ;;  %p840_p3 = scmp.eq.s32.totalorder %s557_s10, 0  ;;  %s104_s12 = int_to_ptr.vmem [resolvable:$true] %s103_s12 }
   0x4   : > { %p834_p2 = pnand %p559_p0, %p91_p1  ;;  %s763_s18 = scalar_lea.hbm %s918_s1, 8192 }
   0x5   : > { %s924_s14 = scalar_select %p840_p3, 1, 0 }
   0x6   : > { %s923_s13 = scalar_select %p834_p2, 1, 0 }
   0x7   : > { %p730_p4 = pneg %p834_p2  ;;  %p764_p6 = scmp.ne.s32.totalorder %s918_s1, %s763_s18 }
   0x8   : > { %p770_p10 = scmp.lt.u32.totalorder %s763_s18, %s918_s1 }
   0x9   : > { %p848_p5 = pnand %p840_p3, %p730_p4 }
   0xb   : > { %p765_p7 = pneg %p848_p5 }
   0xd   : > { %p766_p8 = pnand %p765_p7, %p764_p6 }
   0xf   : > { %p767_p9 = pneg %p766_p8 }
  0x11   : > { %p772_p11 = pnand %p770_p10, %p767_p9 }
  0x13   : > { %775 = shalt.err (!%p772_p11)
}
  0x14   : > { %s776_s23 = scalar_lea.vmem %s104_s12, 8192  ;;  %p784_p1 = scmp.lt.s32.totalorder %s104_s12, %s104_s12 }
  0x15   : > { %p777_p12 = scmp.ne.s32.totalorder %s104_s12, %s776_s23  ;;  %p785_p4 = scmp.lt.s32.totalorder %s776_s23, %s776_s23 }
  0x17   : > { %p779_p13 = pnand %p777_p12, %p765_p7  ;;  %p786_p3 = por %p785_p4, %p784_p1 }
  0x19   : > { %p780_p0 = pneg %p779_p13 }
  0x1b   : > { %p787_p2 = pnand %p786_p3, %p780_p0 }
  0x1d   : > { %790 = shalt.err (!%p787_p2)
}
  0x1e   : > { %s804_s24 = smov 128   ;;  %s805_s25 = smov 8  }
  0x1f   : > { %733 = dma.hbm_to_vmem [thread:$0]  (!%p848_p5), %s918_s1, 8192, %s104_s12, [#allocation3], %s804_s24, %s804_s24, %s805_s25  }
  0x20   : > { %p926_p6 = scmp.ne.s32.totalorder %s923_s13, 0 }
  0x21   : > { %p927_p8 = scmp.ne.s32.totalorder (!%p926_p6), %s924_s14, 0 }
  0x22   : > { %128 = sbr.rel (%p926_p6) target bundleno = 436 (0x1b4), region = 28 }
  0x29   : > { %796 = dma.done.wait (%p927_p8), [#allocation3], 8192  }
  0x2a   : > { %798 = vsyncadd (%p927_p8), [#allocation3], 4294959104  ;;  %s564_s28 = sshll.u32 %s557_s10, 1  ;;  %v806_v0 = vmov 0   ;;  %v287_v3 = vld [vmem:[#allocation2 + $0x80] sm:$0xff]  ;;  %v288_v4 = vld [vmem:[#allocation2 + $0x88] sm:$0xff] }
  0x2b   : > { %753 = vset.pattern.permute.xlu1 %v806_v0  ;;  %752 = vset.pattern.permute.xlu0 %v806_v0  ;;  %p151_p2 = scmp.lt.s32.totalorder %s564_s28, 3  ;;  %v319_v5 = vld [vmem:[#allocation2 + $0x180] sm:$0xff]  ;;  %v662_v8 = vpack.c.bf16 %v288_v4, %v287_v3  ;;  %v320_v9 = vld [vmem:[#allocation2 + $0x188] sm:$0xff]  ;;  %v289_v16 = vld [vmem:[#allocation2 + $0x90] sm:$0xff]  ;;  %v807_v21 = vmov 2   ;;  %v808_v22 = vmov 1  }
  0x2c   : > { %v271_v10 = vld [vmem:[#allocation2] sm:$0xff]  ;;  %v272_v11 = vld [vmem:[#allocation2 + $0x8] sm:$0xff]  ;;  %v694_v12 = vpack.c.bf16 %v320_v9, %v319_v5  ;;  %v290_v18 = vld [vmem:[#allocation2 + $0x98] sm:$0xff]  ;;  %v809_v42 = vmov 3  }
  0x2d   : > { %s929_s28 = smov (!%p151_p2, %s564_s28), 3  ;;  %v664_v13 = vpack.c.bf16 %v272_v11, %v271_v10  ;;  %v303_v14 = vld [vmem:[#allocation2 + $0x100] sm:$0xff]  ;;  %v304_v15 = vld [vmem:[#allocation2 + $0x108] sm:$0xff]  ;;  %663 = vmatprep.subr.bf16.mxu0 %v662_v8  ;;  %v321_v19 = vld [vmem:[#allocation2 + $0x190] sm:$0xff]  ;;  %v666_v23 = vpack.c.bf16 %v290_v18, %v289_v16 }
  0x2e   : > { %s565_s29 = sshll.u32 %s929_s28, 3  ;;  %v696_v17 = vpack.c.bf16 %v304_v15, %v303_v14  ;;  %v322_v20 = vld [vmem:[#allocation2 + $0x198] sm:$0xff]  ;;  %v273_v25 = vld [vmem:[#allocation2 + $0x10] sm:$0xff]  ;;  %v291_v30 = vld [vmem:[#allocation2 + $0xa0] sm:$0xff]  ;;  %695 = vmatprep.subr.bf16.mxu1 %v694_v12 }
  0x2f   : > { %s154_s4 = scalar_lea.vmem %s917_s0, %s565_s29  ;;  %v698_v24 = vpack.c.bf16 %v322_v20, %v321_v19  ;;  %v274_v26 = vld [vmem:[#allocation2 + $0x18] sm:$0xff]  ;;  %v305_v27 = vld [vmem:[#allocation2 + $0x110] sm:$0xff]  ;;  %v292_v31 = vld [vmem:[#allocation2 + $0xa8] sm:$0xff]  ;;  %665 = vmatpush3.bf16.msra.mxu0 %v664_v13  ;;  %s160_s7 = scalar_lea.vmem %s919_s2, %s565_s29 }
  0x30   : > { %v884_v1 = vld [vmem:[%s154_s4 + $0x8] sm:$0xff]  ;;  %v162_v2 = vld [vmem:[%s154_s4] sm:$0xff]  ;;  %v306_v29 = vld [vmem:[#allocation2 + $0x118] sm:$0xff]  ;;  %v668_v33 = vpack.c.bf16 %v274_v26, %v273_v25  ;;  %697 = vmatpush3.bf16.msra.mxu1 %v696_v17  ;;  %667 = vmatprep.subr.bf16.mxu0 %v666_v23  ;;  %v670_v37 = vpack.c.bf16 %v292_v31, %v291_v30 }
  0x31   : > { %173 = vperm.xlu1 %753, %v884_v1   ;;  %170 = vperm.xlu0 %752, %v162_v2   ;;  %v207_v6 = vadd.s32 256, %v162_v2  ;;  %v183_v7 = vadd.s32 128, %v162_v2  ;;  %v184_v28 = vadd.s32 128, %v884_v1  ;;  %v231_v32 = vadd.s32 384, %v162_v2  ;;  %v323_v34 = vld [vmem:[#allocation2 + $0x1a0] sm:$0xff]  ;;  %v324_v35 = vld [vmem:[#allocation2 + $0x1a8] sm:$0xff] }
  0x32   : > { %v700_v36 = vpack.c.bf16 %v306_v29, %v305_v27  ;;  %699 = vmatprep.subr.bf16.mxu1 %v698_v24  ;;  %v702_v38 = vpack.c.bf16 %v324_v35, %v323_v34  ;;  %v275_v39 = vld [vmem:[#allocation2 + $0x20] sm:$0xff]  ;;  %v276_v40 = vld [vmem:[#allocation2 + $0x28] sm:$0xff]  ;;  %v293_v44 = vld [vmem:[#allocation2 + $0xb0] sm:$0xff]  ;;  %v232_v46 = vadd.s32 384, %v884_v1  ;;  %v208_v49 = vadd.s32 256, %v884_v1 }
  0x33   : > { %v307_v41 = vld [vmem:[#allocation2 + $0x120] sm:$0xff]  ;;  %v308_v43 = vld [vmem:[#allocation2 + $0x128] sm:$0xff]  ;;  %v294_v45 = vld [vmem:[#allocation2 + $0xb8] sm:$0xff]  ;;  %669 = vmatpush3.bf16.msra.mxu0 %v668_v33  ;;  %v672_v50 = vpack.c.bf16 %v276_v40, %v275_v39 }
  0x34   : > { %v325_v47 = vld [vmem:[#allocation2 + $0x1b0] sm:$0xff]  ;;  %v326_v48 = vld [vmem:[#allocation2 + $0x1b8] sm:$0xff]  ;;  %701 = vmatpush3.bf16.msra.mxu1 %v700_v36  ;;  %671 = vmatprep.subr.bf16.mxu0 %v670_v37  ;;  %v704_v51 = vpack.c.bf16 %v308_v43, %v307_v41  ;;  %v674_v52 = vpack.c.bf16 %v294_v45, %v293_v44  ;;  %v295_v58 = vld [vmem:[#allocation2 + $0xc0] sm:$0xff]  ;;  %v164_v44 = vlaneseq }
  0x35   : > { %755 = vset.pattern.permute.xlu1 %v807_v21  ;;  %754 = vset.pattern.permute.xlu0 %v808_v22  ;;  %v277_v53 = vld [vmem:[#allocation2 + $0x30] sm:$0xff]  ;;  %v278_v54 = vld [vmem:[#allocation2 + $0x38] sm:$0xff]  ;;  %v706_v56 = vpack.c.bf16 %v326_v48, %v325_v47  ;;  %v296_v59 = vld [vmem:[#allocation2 + $0xc8] sm:$0xff] }
  0x36   : > { %210 = vperm.xlu1 %755, %v207_v6   ;;  %186 = vperm.xlu0 %754, %v183_v7   ;;  %v309_v55 = vld [vmem:[#allocation2 + $0x130] sm:$0xff]  ;;  %v310_v57 = vld [vmem:[#allocation2 + $0x138] sm:$0xff]  ;;  %v327_v60 = vld [vmem:[#allocation2 + $0x1c0] sm:$0xff]  ;;  %v676_v62 = vpack.c.bf16 %v278_v54, %v277_v53  ;;  %v678_v0 = vpack.c.bf16 %v296_v59, %v295_v58  ;;  %v890_v45 = vand.u32 127, %v164_v44 }
  0x37   : > { %703 = vmatprep.subr.bf16.mxu1 %v702_v38  ;;  %v328_v61 = vld [vmem:[#allocation2 + $0x1c8] sm:$0xff]  ;;  %673 = vmatpush3.bf16.msra.mxu0 %v672_v50  ;;  %v708_v63 = vpack.c.bf16 %v310_v57, %v309_v55  ;;  %v279_v1 = vld [vmem:[#allocation2 + $0x40] sm:$0xff]  ;;  %v297_v6 = vld [vmem:[#allocation2 + $0xd0] sm:$0xff]  ;;  %v810_v55 = vmov 1.0  }
  0x38   : > { %705 = vmatpush3.bf16.msra.mxu1 %v704_v51  ;;  %675 = vmatprep.subr.bf16.mxu0 %v674_v52  ;;  %v280_v2 = vld [vmem:[#allocation2 + $0x48] sm:$0xff]  ;;  %v311_v3 = vld [vmem:[#allocation2 + $0x140] sm:$0xff]  ;;  %v710_v4 = vpack.c.bf16 %v328_v61, %v327_v60  ;;  %v298_v7 = vld [vmem:[#allocation2 + $0xd8] sm:$0xff]  ;;  %v166_v48 = vadd.s32 128, %v890_v45  ;;  %v167_v53 = vadd.s32 256, %v890_v45 }
  0x39   : > { %707 = vmatprep.subr.bf16.mxu1 %v706_v56  ;;  %v312_v5 = vld [vmem:[#allocation2 + $0x148] sm:$0xff]  ;;  %v329_v8 = vld [vmem:[#allocation2 + $0x1d0] sm:$0xff]  ;;  %v330_v9 = vld [vmem:[#allocation2 + $0x1d8] sm:$0xff]  ;;  %v680_v10 = vpack.c.bf16 %v280_v2, %v279_v1  ;;  %v682_v12 = vpack.c.bf16 %v298_v7, %v297_v6 }
  0x3a   : > { %756 = vset.pattern.permute.xlu1 %v809_v42  ;;  %189 = vperm.xlu0 %754, %v184_v28   ;;  %v712_v11 = vpack.c.bf16 %v312_v5, %v311_v3  ;;  %v281_v13 = vld [vmem:[#allocation2 + $0x50] sm:$0xff]  ;;  %v282_v14 = vld [vmem:[#allocation2 + $0x58] sm:$0xff]  ;;  %v714_v16 = vpack.c.bf16 %v330_v9, %v329_v8  ;;  %v299_v18 = vld [vmem:[#allocation2 + $0xe0] sm:$0xff] }
  0x3b   : > { %234 = vperm.xlu1 %756, %v231_v32   ;;  %677 = vmatpush3.bf16.msra.mxu0 %v676_v62  ;;  %v313_v15 = vld [vmem:[#allocation2 + $0x150] sm:$0xff]  ;;  %v314_v17 = vld [vmem:[#allocation2 + $0x158] sm:$0xff]  ;;  %v300_v19 = vld [vmem:[#allocation2 + $0xe8] sm:$0xff]  ;;  %v684_v22 = vpack.c.bf16 %v282_v14, %v281_v13 }
  0x3c   : > { %709 = vmatpush3.bf16.msra.mxu1 %v708_v63  ;;  %679 = vmatprep.subr.bf16.mxu0 %v678_v0  ;;  %v331_v20 = vld [vmem:[#allocation2 + $0x1e0] sm:$0xff]  ;;  %v716_v23 = vpack.c.bf16 %v314_v17, %v313_v15  ;;  %v686_v24 = vpack.c.bf16 %v300_v19, %v299_v18  ;;  %v284_v26 = vld [vmem:[#allocation2 + $0x68] sm:$0xff]  ;;  %v301_v30 = vld [vmem:[#allocation2 + $0xf0] sm:$0xff] }
  0x3d   : > { %711 = vmatprep.subr.bf16.mxu1 %v710_v4  ;;  %v283_v25 = vld [vmem:[#allocation2 + $0x60] sm:$0xff]  ;;  %v316_v29 = vld [vmem:[#allocation2 + $0x168] sm:$0xff]  ;;  %v302_v31 = vld [vmem:[#allocation2 + $0xf8] sm:$0xff] }
  0x3e   : > { %758 = vset.pattern.permute.xlu0 %v809_v42  ;;  %v315_v27 = vld [vmem:[#allocation2 + $0x160] sm:$0xff]  ;;  %v333_v32 = vld [vmem:[#allocation2 + $0x1f0] sm:$0xff]  ;;  %v334_v33 = vld [vmem:[#allocation2 + $0x1f8] sm:$0xff]  ;;  %v688_v34 = vpack.c.bf16 %v284_v26, %v283_v25  ;;  %v690_v36 = vpack.c.bf16 %v302_v31, %v301_v30 }
  0x3f   : > { %757 = vset.pattern.permute.xlu1 %v807_v21  ;;  %237 = vperm.xlu0 %758, %v232_v46   ;;  %v332_v21 = vld [vmem:[#allocation2 + $0x1e8] sm:$0xff]  ;;  %v720_v35 = vpack.c.bf16 %v316_v29, %v315_v27  ;;  %v285_v37 = vld [vmem:[#allocation2 + $0x70] sm:$0xff]  ;;  %v286_v38 = vld [vmem:[#allocation2 + $0x78] sm:$0xff]  ;;  %v722_v39 = vpack.c.bf16 %v334_v33, %v333_v32 }
  0x40   : > { %213 = vperm.xlu1 %757, %v208_v49   ;;  %681 = vmatpush3.bf16.msra.mxu0 %v680_v10  ;;  %v718_v28 = vpack.c.bf16 %v332_v21, %v331_v20  ;;  %v317_v40 = vld [vmem:[#allocation2 + $0x170] sm:$0xff]  ;;  %v318_v41 = vld [vmem:[#allocation2 + $0x178] sm:$0xff]  ;;  %v692_v42 = vpack.c.bf16 %v286_v38, %v285_v37  ;;  %v168_v49 = vadd.s32 384, %v890_v45 }
  0x41   : > { %713 = vmatpush3.bf16.msra.mxu1 %v712_v11  ;;  %683 = vmatprep.subr.bf16.mxu0 %v682_v12  ;;  %v724_v43 = vpack.c.bf16 %v318_v41, %v317_v40 }
  0x42   : > { %715 = vmatprep.subr.bf16.mxu1 %v714_v16 }
  0x44   : > { %685 = vmatpush3.bf16.msra.mxu0 %v684_v22 }
  0x45   : > { %717 = vmatpush3.bf16.msra.mxu1 %v716_v23  ;;  %687 = vmatprep.subr.bf16.mxu0 %v686_v24 }
  0x46   : > { %719 = vmatprep.subr.bf16.mxu1 %v718_v28 }
  0x48   : > { %689 = vmatpush3.bf16.msra.mxu0 %v688_v34 }
  0x49   : > { %721 = vmatpush3.bf16.msra.mxu1 %v720_v35  ;;  %691 = vmatprep.subr.bf16.mxu0 %v690_v36 }
  0x4a   : > { %723 = vmatprep.subr.bf16.mxu1 %v722_v39 }
  0x4c   : > { %693 = vmatpush3.bf16.msra.mxu0 %v692_v42 }
  0x4d   : > { %725 = vmatpush3.bf16.msra.mxu1 %v724_v43 }
  0xb0   : > { %v892_v46 = vpop.permute.xlu1 %173  ;;  %v171_v47 = vpop.permute.xlu0 %170 }
  0xb1   : > { %vm176_vm0 = vcmp.eq.s32.totalorder %v166_v48, %v171_v47  ;;  %vm178_vm8 = vcmp.eq.s32.totalorder %v168_v49, %v171_v47  ;;  %vm175_vm10 = vcmp.eq.s32.totalorder %v890_v45, %v171_v47 }
  0xb5   : > { %v211_v50 = vpop.permute.xlu1 %210  ;;  %v187_v51 = vpop.permute.xlu0 %186 }
  0xb6   : > { %vm192_vm1 = vcmp.eq.s32.totalorder %v166_v48, %v187_v51  ;;  %vm216_vm2 = vcmp.eq.s32.totalorder %v166_v48, %v211_v50  ;;  %vm194_vm4 = vcmp.eq.s32.totalorder %v168_v49, %v187_v51  ;;  %vm218_vm5 = vcmp.eq.s32.totalorder %v168_v49, %v211_v50 }
  0xb7   : > { %vm200_vm3 = vmor %vm176_vm0, %vm192_vm1  ;;  %vm191_vm6 = vcmp.eq.s32.totalorder %v890_v45, %v187_v51  ;;  %vm215_vm15 = vcmp.eq.s32.totalorder %v890_v45, %v211_v50 }
  0xb8   : > { %vm224_vm7 = vmor %vm200_vm3, %vm216_vm2  ;;  %vm193_vm2 = vcmp.eq.s32.totalorder %v167_v53, %v187_v51 }
  0xb9   : > { %vm202_vm9 = vmor %vm178_vm8, %vm194_vm4  ;;  %v190_v54 = vpop.permute.xlu0 %189  ;;  %vm217_vm8 = vcmp.eq.s32.totalorder %v167_v53, %v211_v50 }
  0xba   : > { %v235_v52 = vpop.permute.xlu1 %234  ;;  %vm226_vm11 = vmor %vm202_vm9, %vm218_vm5  ;;  %vm177_vm5 = vcmp.eq.s32.totalorder %v167_v53, %v171_v47 }
  0xbb   : > { %vm240_vm12 = vcmp.eq.s32.totalorder %v166_v48, %v235_v52  ;;  %vm242_vm13 = vcmp.eq.s32.totalorder %v168_v49, %v235_v52  ;;  %vm199_vm14 = vmor %vm175_vm10, %vm191_vm6  ;;  %vm239_vm1 = vcmp.eq.s32.totalorder %v890_v45, %v235_v52  ;;  %vm241_vm6 = vcmp.eq.s32.totalorder %v167_v53, %v235_v52 }
  0xbc   : > { %vm248_vm0 = vmor %vm224_vm7, %vm240_vm12  ;;  %vm196_vm10 = vcmp.eq.s32.totalorder %v166_v48, %v190_v54 }
  0xbd   : > { %576 = vmatprep.mubr.msk.f32.mxu0 %vm248_vm0, %v810_v55  ;;  %vm250_vm3 = vmor %vm226_vm11, %vm242_vm13  ;;  %vm180_vm11 = vcmp.eq.s32.totalorder %v166_v48, %v892_v46 }
  0xbe   : > { %580 = vmatprep.mubr.msk.f32.mxu1 %vm250_vm3, %v810_v55  ;;  %vm223_vm4 = vmor %vm199_vm14, %vm215_vm15  ;;  %v238_v57 = vpop.permute.xlu0 %237  ;;  %vm198_vm14 = vcmp.eq.s32.totalorder %v168_v49, %v190_v54 }
  0xbf   : > { %vm247_vm9 = vmor %vm223_vm4, %vm239_vm1  ;;  %v214_v56 = vpop.permute.xlu1 %213  ;;  %vm244_vm3 = vcmp.eq.s32.totalorder %v166_v48, %v238_v57 }
  0xc0   : > { %577 = vmatmul.mubr.msk.f32.vlgmr.msra.gmra.mrb[0].mxu0 %vm247_vm9, %v810_v55  ;;  %vm201_vm7 = vmor %vm177_vm5, %vm193_vm2  ;;  %vm220_vm0 = vcmp.eq.s32.totalorder %v166_v48, %v214_v56  ;;  %vm222_vm1 = vcmp.eq.s32.totalorder %v168_v49, %v214_v56  ;;  %vm182_vm9 = vcmp.eq.s32.totalorder %v168_v49, %v892_v46  ;;  %vm246_vm2 = vcmp.eq.s32.totalorder %v168_v49, %v238_v57 }
  0xc1   : > { %vm225_vm12 = vmor %vm201_vm7, %vm217_vm8  ;;  %vm195_vm7 = vcmp.eq.s32.totalorder %v890_v45, %v190_v54 }
  0xc2   : > { %vm249_vm13 = vmor %vm225_vm12, %vm241_vm6  ;;  %vm219_vm6 = vcmp.eq.s32.totalorder %v890_v45, %v214_v56 }
  0xc3   : > { %581 = vmatmul.mubr.msk.f32.vlgmr.msra.gmra.mrb[0].mxu1 %vm249_vm13, %v810_v55  ;;  %vm204_vm15 = vmor %vm180_vm11, %vm196_vm10  ;;  %vm179_vm13 = vcmp.eq.s32.totalorder %v890_v45, %v892_v46  ;;  %vm243_vm10 = vcmp.eq.s32.totalorder %v890_v45, %v238_v57 }
  0xc4   : > { %vm228_vm4 = vmor %vm204_vm15, %vm220_vm0  ;;  %vm197_vm0 = vcmp.eq.s32.totalorder %v167_v53, %v190_v54 }
  0xc5   : > { %vm252_vm5 = vmor %vm228_vm4, %vm244_vm3  ;;  %vm221_vm3 = vcmp.eq.s32.totalorder %v167_v53, %v214_v56 }
  0xc6   : > { %578 = vmatprep.mubr.msk.f32.mxu0 %vm252_vm5, %v810_v55  ;;  %vm206_vm8 = vmor %vm182_vm9, %vm198_vm14  ;;  %vm181_vm5 = vcmp.eq.s32.totalorder %v167_v53, %v892_v46  ;;  %vm245_vm9 = vcmp.eq.s32.totalorder %v167_v53, %v238_v57 }
  0xc7   : > { %vm230_vm12 = vmor %vm206_vm8, %vm222_vm1 }
  0xc8   : > { %vm254_vm11 = vmor %vm230_vm12, %vm246_vm2 }
  0xc9   : > { %582 = vmatprep.mubr.msk.f32.mxu1 %vm254_vm11, %v810_v55  ;;  %vm203_vm15 = vmor %vm179_vm13, %vm195_vm7 }
  0xca   : > { %vm227_vm4 = vmor %vm203_vm15, %vm219_vm6 }
  0xcb   : > { %vm251_vm14 = vmor %vm227_vm4, %vm243_vm10 }
  0xcc   : > { %579 = vmatmul.mubr.msk.f32.gmra.mrb[2].mxu0 %vm251_vm14, %v810_v55  ;;  %vm205_vm1 = vmor %vm181_vm5, %vm197_vm0 }
  0xcd   : > { %vm229_vm8 = vmor %vm205_vm1, %vm221_vm3 }
  0xce   : > { %vm253_vm2 = vmor %vm229_vm8, %vm245_vm9 }
  0xcf   : > { %583 = vmatmul.mubr.msk.f32.gmra.mrb[2].mxu1 %vm253_vm2, %v810_v55 }
 0x193   : > { %v618_v58 = vpop.f32.mrb[0].mxu0 }
 0x194   : > { %v619_v59 = vpop.f32.mrb[1].mxu0 }
 0x195   : > { %v620_v60 = vadd.f32 %v619_v59, %v618_v58 }
 0x196   : > { %v656_v61 = vpop.f32.mrb[0].mxu1 }
 0x197   : > { %v657_v62 = vpop.f32.mrb[1].mxu1 }
 0x198   : > { %v658_v63 = vadd.f32 %v657_v62, %v656_v61 }
 0x19a   : > { %v477_v0 = vadd.f32 %v658_v63, %v620_v60 }
 0x19c   : > { %759 = vtanh.f32 %v477_v0 }
 0x19f   : > { %v621_v1 = vpop.f32.mrb[2].mxu0 }
 0x1a0   : > { %v622_v2 = vpop.f32.mrb[3].mxu0 }
 0x1a1   : > { %v623_v3 = vadd.f32 %v622_v2, %v621_v1 }
 0x1a2   : > { %v659_v4 = vpop.f32.mrb[2].mxu1 }
 0x1a3   : > { %v660_v5 = vpop.f32.mrb[3].mxu1 }
 0x1a4   : > { %v661_v6 = vadd.f32 %v660_v5, %v659_v4 }
 0x1a6   : > { %v760_v7 = vpop.eup %759  ;;  %v482_v8 = vadd.f32 %v661_v6, %v623_v3 }
 0x1a7   : > { %487 = vst [vmem:[%s160_s7] sm:$0xff] %v760_v7 }
 0x1a8   : > { %761 = vtanh.f32 %v482_v8 }
 0x1b2   : > { %v762_v9 = vpop.eup %761 }
 0x1b3   : > { %488 = vst [vmem:[%s160_s7 + $0x8] sm:$0xff] %v762_v9 }
 0x1b4 PF: > { %s13_s9 = sadd.s32 1, %s801_s9  }
 0x1b5   : > { %p10_p3 = scmp.ge.s32.totalorder %s13_s9, 4  }
 0x1b7   :  { %12 = sbr.rel (!%p10_p3) target bundleno = 1 (0x1), region = 63 }
 0x1be   :  { %511 = vsyncpa [#allocation3], 1 }
 0x1bf   :  { %513 = vsyncpa [#allocation3 + $0x1], 1 }

</bundles_post_ra>
